<compile_context>
chip_gen: v7x
topology: tpu7x:2x2x1
jax: 0.10.0
libtpu: 0.0.40
codegen_flags: <defaults>
</compile_context>

<pallas_src>
import jax
import jax.numpy as jnp
from jax.experimental import pallas as pl
from jax.experimental.pallas import tpu as pltpu


def _cond_emb_kernel(t_ref, w1_ref, b1_ref, w2_ref, b2_ref, o_ref):
    # In-kernel cast of the activation to the weight dtype (bf16) -- VPU, ~free.
    x = t_ref[...].astype(w1_ref.dtype)
    # First Linear: (TM, d_model) @ (d_model, dim_p) -> f32 accumulator.
    h = jnp.dot(x, w1_ref[...], preferred_element_type=jnp.float32)
    h = h + b1_ref[...]                 # bias add in f32
    h = h * jax.nn.sigmoid(h)           # SiLU in f32 (VPU/EUP)
    # Second Linear: (TM, dim_p) @ (dim_p, dim_p) -> f32 accumulator.
    out = jnp.dot(h.astype(w2_ref.dtype), w2_ref[...],
                  preferred_element_type=jnp.float32)
    out = out + b2_ref[...]
    o_ref[...] = out.astype(o_ref.dtype)


def _round_up(x: int, m: int) -> int:
    return (x + m - 1) // m * m


def _pad2(a, rows: int, cols: int):
    return jnp.pad(a, ((0, rows - a.shape[0]), (0, cols - a.shape[1])))


def prepare_cond_emb_params(w1, b1, w2, b2, *, weight_dtype=jnp.bfloat16):
    """One-time (init-time) pad + cast of the parameters.

    w1 : (d_model, dim)   (transposed vs PyTorch's (dim, d_model))
    b1 : (1, dim)
    w2 : (dim, dim)
    b2 : (1, dim)

    Returns (w1_p, b1_p, w2_p, b2_p) with the feature axis zero-padded to a
    multiple of 128 lanes, weights cast to `weight_dtype` (bf16 by default;
    pass jnp.float32 for strict parity with the f32 PyTorch module), biases
    kept f32.  Padded lanes give silu(0)=0 and hit zero rows of w2, so results
    are unchanged.
    """
    d_model, dim = w1.shape
    LANE = 128
    dim_p = _round_up(dim, LANE)
    w1_p = _pad2(w1, d_model, dim_p).astype(weight_dtype)
    w2_p = _pad2(w2, dim_p, dim_p).astype(weight_dtype)
    b1_p = _pad2(b1, 1, dim_p).astype(jnp.float32)
    b2_p = _pad2(b2, 1, dim_p).astype(jnp.float32)
    return w1_p, b1_p, w2_p, b2_p


def conditional_embedding(t, w1_p, b1_p, w2_p, b2_p, *, tm=None,
                          out_dtype=jnp.bfloat16, out_dim=None):
    """Forward of ConditionalEmbedding: y = silu(t @ w1 + b1) @ w2 + b2.

    t            : (B, d_model), any float dtype (kernel casts to weight dtype)
    w1_p .. b2_p : pre-padded / pre-cast params from prepare_cond_emb_params()
    out_dim      : if given, slice the lane-padded output back to (B, out_dim);
                   otherwise the padded (B_p, dim_p) slab is returned (cheaper
                   for consumers that can take it / fuse the slice themselves).
    """
    B, d_model = t.shape
    dim_p = w1_p.shape[1]

    # Batch tile: target a grid of length 2 (one fat tile per v7x TensorCore;
    # near-optimal on single-TC chips too), multiple of 8 sublanes, capped at
    # 1024 rows to bound per-step VMEM and keep pipelining for very large B.
    if tm is None:
        tm = min(1024, max(8, _round_up(pl.cdiv(B, 2), 8)))
    B_p = _round_up(B, tm)

    # Only batch padding of t here (dtype untouched; cast happens in-kernel).
    t_p = jnp.pad(t, ((0, B_p - B), (0, 0)))

    grid = (B_p // tm,)

    itemsize = jnp.dtype(out_dtype).itemsize
    cost = pl.CostEstimate(
        flops=2 * B_p * d_model * dim_p + 2 * B_p * dim_p * dim_p + 4 * B_p * dim_p,
        transcendentals=B_p * dim_p,
        bytes_accessed=(t_p.size * t_p.dtype.itemsize
                        + w1_p.size * w1_p.dtype.itemsize
                        + w2_p.size * w2_p.dtype.itemsize
                        + b1_p.size * 4 + b2_p.size * 4
                        + B_p * dim_p * itemsize),
    )

    out_p = pl.pallas_call(
        _cond_emb_kernel,
        out_shape=jax.ShapeDtypeStruct((B_p, dim_p), out_dtype),
        grid_spec=pltpu.PrefetchScalarGridSpec(
            num_scalar_prefetch=0,
            grid=grid,
            in_specs=[
                pl.BlockSpec((tm, d_model), lambda i: (i, 0)),     # t: batch-tiled
                pl.BlockSpec((d_model, dim_p), lambda i: (0, 0)),  # w1: resident
                pl.BlockSpec((1, dim_p), lambda i: (0, 0)),        # b1: resident
                pl.BlockSpec((dim_p, dim_p), lambda i: (0, 0)),    # w2: resident
                pl.BlockSpec((1, dim_p), lambda i: (0, 0)),        # b2: resident
            ],
            out_specs=pl.BlockSpec((tm, dim_p), lambda i: (i, 0)),
        ),
        compiler_params=pltpu.CompilerParams(
            dimension_semantics=("parallel",),
        ),
        cost_estimate=cost,
    )(t_p, w1_p, b1_p, w2_p, b2_p)

    if out_dim is not None:
        # NOTE: prefer consuming the padded slab (or fusing this slice under
        # the caller's jit) -- it is an extra HBM pass at standalone use.
        return out_p[:B, :out_dim]
    return out_p


def _reference_f32(t, w1, b1, w2, b2):
    h = t @ w1 + b1
    h = h * jax.nn.sigmoid(h)
    return h @ w2 + b2


def _reference_mixed(t, w1, b1, w2, b2):
    # Same mixed precision as the kernel: bf16 matmul inputs, f32 accumulation.
    bf = jnp.bfloat16
    h = jnp.dot(t.astype(bf), w1.astype(bf), preferred_element_type=jnp.float32)
    h = h + b1
    h = h * jax.nn.sigmoid(h)
    out = jnp.dot(h.astype(bf), w2.astype(bf), preferred_element_type=jnp.float32)
    return out + b2


if __name__ == "__main__":
    # Shapes consistent with the module: d_model=32 (even), dim=64, batch=512
    # (enough rows to exercise the 2-step batch-tiled grid: TM=256).
    B, d_model, dim = 512, 32, 64
    assert d_model % 2 == 0

    key = jax.random.PRNGKey(0)
    k_t, k_w1, k_b1, k_w2, k_b2 = jax.random.split(key, 5)

    # Deterministic init (roughly PyTorch Linear's uniform(+-1/sqrt(fan_in))).
    s1 = 1.0 / jnp.sqrt(d_model)
    s2 = 1.0 / jnp.sqrt(dim)
    t = jax.random.normal(k_t, (B, d_model), dtype=jnp.float32)
    w1 = jax.random.uniform(k_w1, (d_model, dim), minval=-s1, maxval=s1,
                            dtype=jnp.float32)
    b1 = jax.random.uniform(k_b1, (1, dim), minval=-s1, maxval=s1,
                            dtype=jnp.float32)
    w2 = jax.random.uniform(k_w2, (dim, dim), minval=-s2, maxval=s2,
                            dtype=jnp.float32)
    b2 = jax.random.uniform(k_b2, (1, dim), minval=-s2, maxval=s2,
                            dtype=jnp.float32)

    # One-time parameter prep (padding + bf16 cast hoisted out of the call path).
    w1_p, b1_p, w2_p, b2_p = prepare_cond_emb_params(w1, b1, w2, b2)

    out = conditional_embedding(t, w1_p, b1_p, w2_p, b2_p, out_dim=dim)
    out = jax.block_until_ready(out)
    assert out.shape == (B, dim)
    out_f32 = out.astype(jnp.float32)

    # Check vs a reference using the same mixed precision (allow bf16 output
    # rounding on top of the mixed-precision matmuls).
    ref_mixed = _reference_mixed(t, w1, b1, w2, b2)
    assert jnp.allclose(out_f32, ref_mixed, atol=2e-2, rtol=2e-2), \
        "mismatch vs mixed-precision reference"

    # Loose check vs the full-f32 PyTorch-equivalent math.
    ref_f32 = _reference_f32(t, w1, b1, w2, b2)
    assert jnp.allclose(out_f32, ref_f32, atol=6e-2, rtol=6e-2), \
        "mismatch vs f32 reference"

    print("KERNEL_OK")
</pallas_src>

<mosaic_0001>
module attributes {stable_mosaic.version = 11 : i64} {
  func.func @_cond_emb_kernel(%arg0: i32, %arg1: memref<256x32xf32, #tpu.memory_space<vmem>>, %arg2: memref<32x128xbf16, #tpu.memory_space<vmem>>, %arg3: memref<1x128xf32, #tpu.memory_space<vmem>>, %arg4: memref<128x128xbf16, #tpu.memory_space<vmem>>, %arg5: memref<1x128xf32, #tpu.memory_space<vmem>>, %arg6: memref<256x128xbf16, #tpu.memory_space<vmem>>) attributes {dimension_semantics = [#tpu.dimension_semantics<parallel>], iteration_bounds = array<i64: 2>, scalar_prefetch = 0 : i64, scratch_operands = 0 : i64, tpu.core_type = #tpu.core_type<tc>, window_params = [{transform_indices = @transform_0, window_bounds = array<i64: 256, 32>}, {pipeline_mode = #tpu.pipeline_mode<synchronous>, transform_indices = @transform_1, window_bounds = array<i64: 32, 128>}, {pipeline_mode = #tpu.pipeline_mode<synchronous>, transform_indices = @transform_2, window_bounds = array<i64: 1, 128>}, {pipeline_mode = #tpu.pipeline_mode<synchronous>, transform_indices = @transform_3, window_bounds = array<i64: 128, 128>}, {pipeline_mode = #tpu.pipeline_mode<synchronous>, transform_indices = @transform_4, window_bounds = array<i64: 1, 128>}, {transform_indices = @transform_5, window_bounds = array<i64: 256, 128>}]} {
    %c0 = arith.constant 0 : index
    %c0_0 = arith.constant 0 : index
    %0 = vector.load %arg1[%c0, %c0_0] : memref<256x32xf32, #tpu.memory_space<vmem>>, vector<256x32xf32>
    %1 = arith.truncf %0 : vector<256x32xf32> to vector<256x32xbf16>
    %c0_1 = arith.constant 0 : index
    %c0_2 = arith.constant 0 : index
    %2 = vector.load %arg2[%c0_1, %c0_2] : memref<32x128xbf16, #tpu.memory_space<vmem>>, vector<32x128xbf16>
    %cst = arith.constant dense<0.000000e+00> : vector<256x128xf32>
    %3 = tpu.matmul %1, %2, %cst {dimension_numbers = #tpu.dot_dimension_numbers<[1], [0], [0], [1], [0, 0, 1, 1], [], []>} : vector<256x32xbf16>, vector<32x128xbf16>, vector<256x128xf32> -> vector<256x128xf32>
    %c0_3 = arith.constant 0 : index
    %c0_4 = arith.constant 0 : index
    %4 = vector.load %arg3[%c0_3, %c0_4] : memref<1x128xf32, #tpu.memory_space<vmem>>, vector<1x128xf32>
    %5 = vector.broadcast %4 : vector<1x128xf32> to vector<256x128xf32>
    %6 = arith.addf %3, %5 : vector<256x128xf32>
    %7 = arith.negf %6 : vector<256x128xf32>
    %8 = math.exp %7 : vector<256x128xf32>
    %cst_5 = arith.constant 1.000000e+00 : f32
    %9 = vector.broadcast %cst_5 : f32 to vector<256x128xf32>
    %10 = arith.addf %9, %8 : vector<256x128xf32>
    %11 = arith.divf %9, %10 : vector<256x128xf32>
    %12 = arith.mulf %6, %11 : vector<256x128xf32>
    %13 = arith.truncf %12 : vector<256x128xf32> to vector<256x128xbf16>
    %c0_6 = arith.constant 0 : index
    %c0_7 = arith.constant 0 : index
    %14 = vector.load %arg4[%c0_6, %c0_7] : memref<128x128xbf16, #tpu.memory_space<vmem>>, vector<128x128xbf16>
    %cst_8 = arith.constant dense<0.000000e+00> : vector<256x128xf32>
    %15 = tpu.matmul %13, %14, %cst_8 {dimension_numbers = #tpu.dot_dimension_numbers<[1], [0], [0], [1], [0, 0, 1, 1], [], []>} : vector<256x128xbf16>, vector<128x128xbf16>, vector<256x128xf32> -> vector<256x128xf32>
    %c0_9 = arith.constant 0 : index
    %c0_10 = arith.constant 0 : index
    %16 = vector.load %arg5[%c0_9, %c0_10] : memref<1x128xf32, #tpu.memory_space<vmem>>, vector<1x128xf32>
    %17 = vector.broadcast %16 : vector<1x128xf32> to vector<256x128xf32>
    %18 = arith.addf %15, %17 : vector<256x128xf32>
    %19 = arith.truncf %18 : vector<256x128xf32> to vector<256x128xbf16>
    %c0_11 = arith.constant 0 : index
    %c0_12 = arith.constant 0 : index
    %20 = vector.load %arg6[%c0_11, %c0_12] : memref<256x128xbf16, #tpu.memory_space<vmem>>, vector<256x128xbf16>
    tpu.vector_store %arg6[%c0_11, %c0_12], %19 {strides = array<i32>} : memref<256x128xbf16, #tpu.memory_space<vmem>>, vector<256x128xbf16>,
    return
  }
  func.func @transform_0(%arg0: i32) -> (i32, i32) {
    %c0_i32 = arith.constant 0 : i32
    %c0_i32_0 = arith.constant 0 : i32
    return %arg0, %c0_i32 : i32, i32
  }
  func.func @transform_1(%arg0: i32) -> (i32, i32) {
    %c0_i32 = arith.constant 0 : i32
    %c0_i32_0 = arith.constant 0 : i32
    %c0_i32_1 = arith.constant 0 : i32
    return %c0_i32, %c0_i32_0 : i32, i32
  }
  func.func @transform_2(%arg0: i32) -> (i32, i32) {
    %c0_i32 = arith.constant 0 : i32
    %c0_i32_0 = arith.constant 0 : i32
    %c0_i32_1 = arith.constant 0 : i32
    return %c0_i32, %c0_i32_0 : i32, i32
  }
  func.func @transform_3(%arg0: i32) -> (i32, i32) {
    %c0_i32 = arith.constant 0 : i32
    %c0_i32_0 = arith.constant 0 : i32
    %c0_i32_1 = arith.constant 0 : i32
    return %c0_i32, %c0_i32_0 : i32, i32
  }
  func.func @transform_4(%arg0: i32) -> (i32, i32) {
    %c0_i32 = arith.constant 0 : i32
    %c0_i32_0 = arith.constant 0 : i32
    %c0_i32_1 = arith.constant 0 : i32
    return %c0_i32, %c0_i32_0 : i32, i32
  }
  func.func @transform_5(%arg0: i32) -> (i32, i32) {
    %c0_i32 = arith.constant 0 : i32
    %c0_i32_0 = arith.constant 0 : i32
    return %arg0, %c0_i32 : i32, i32
  }
}

</mosaic_0001>

<bundles_post_ra>
// kernel: tpu_custom_call.1
= control target key start
LH: loop header
LB: loop body
LE: loop exit
PB: predicated region body
PF: predicated region fallthrough
CT: control target
= control target key end

     0   :  { %10 = vsyncpa [#allocation3], 0  ;;  %s2273_s0 = inlined_call_operand.vmem [shape: f32[512,32], index: 0, kind: input, shape index: {}]   ;;  %s2274_s1 = inlined_call_operand.vmem [shape: bf16[32,128], index: 1, kind: input, shape index: {}]   ;;  %s2275_s2 = inlined_call_operand.vmem [shape: f32[1,128], index: 2, kind: input, shape index: {}]   ;;  %s2276_s3 = inlined_call_operand.vmem [shape: bf16[128,128], index: 3, kind: input, shape index: {}]   ;;  %s2277_s4 = inlined_call_operand.vmem [shape: f32[1,128], index: 4, kind: input, shape index: {}]   ;;  %s2278_s5 = inlined_call_operand.hbm [shape: bf16[512,128], index: 5, kind: output, shape index: {}]  }
   0x1   :  { %12 = vsyncpa [#allocation3 + $0x1], 0  ;;  %s1866_s18 = smov 0   ;;  %s1868_s19 = smov 0  }
   0x2   :  { %s1870_s20 = smov 0   ;;  %s1872_s21 = smov 0  }
   0x3 LB: > { %s1887_s22 = sadd.s32 4294967295, %s1831_s21   ;;  %s1216_s23 = sadd.s32 4294967294, %s1831_s21   ;;  %s1831_s21 = sphi %s1872_s21, %s2284_s21   ;;  %s1827_s20 = sphi %s1870_s20, %s2283_s20   ;;  %s1823_s19 = sphi %s1868_s19, %s2282_s19   ;;  %s1819_s18 = sphi %s1866_s18, %s2281_s18  }
   0x4   : > { %s1891_s24 = sadd.s32 1, %s1831_s21   ;;  %s135_s25 = sadd.s32 1, %s1827_s20 }
   0x5   : > { %s132_s26 = ssub.s32 %s1831_s21, %s1891_s24  ;;  %p145_p0 = scmp.ne.s32.totalorder %s1827_s20, %s1823_s19 }
   0x6   : > { %p133_p1 = scmp.eq.s32.totalorder %s132_s26, 0  ;;  %p146_p2 = scmp.eq.s32.totalorder %s1887_s22, 1 }
   0x7   : > { %p151_p3 = scmp.ne.s32.totalorder %s1823_s19, %s1819_s18  ;;  %p152_p4 = scmp.eq.s32.totalorder %s1216_s23, 1 }
   0x8   : > { %s1902_s27 = scalar_select %p133_p1, %s1827_s20, %s135_s25  }
   0x9   : > { %p1904_p5 = por %p146_p2, %p145_p0  ;;  %p1908_p6 = por %p152_p4, %p151_p3 }
   0xa   : > { %p1219_p7 = scmp.ge.s32.totalorder %s1831_s21, 1  ;;  %p191_p8 = scmp.lt.s32.totalorder %s1831_s21, 3 }
   0xc   : > { %p192_p9 = pnand %p1219_p7, %p191_p8 }
   0xd   : > { %v1631_v0 = vld [vmem:[%s2274_s1] sm:$0xff] (!%p192_p9)   ;;  %s1221_s7 = sshll.u32 (!%p192_p9), %s1887_s22, 5  ;;  %v1632_v1 = vld [vmem:[%s2274_s1 + $0x8] sm:$0xff] (!%p192_p9)   ;;  %vm298_vm0 = vcmask (!%p192_p9), 261120   ;;  %v1635_v52 = vld [vmem:[%s2276_s3 + $0x10] sm:$0xff] (!%p192_p9)   ;;  %s216_s16 = sand.u32 (!%p192_p9), 1, %s1823_s19  }
   0xe   : > { %195 = sbr.rel (%p192_p9) target bundleno = 569 (0x239), region = 40  ;;  %p220_p10 = scmp.lt.s32.totalorder (!%p192_p9), %s1221_s7, 63  ;;  %1490 = vmatprep.subr.bf16.mxu0 (!%p192_p9), %v1631_v0  ;;  %v1633_v50 = vld [vmem:[%s2276_s3] sm:$0xff] (!%p192_p9)   ;;  %v1634_v51 = vld [vmem:[%s2276_s3 + $0x8] sm:$0xff] (!%p192_p9)   ;;  %v1636_v53 = vld [vmem:[%s2276_s3 + $0x18] sm:$0xff] (!%p192_p9)  }
   0xf   : > { %1491 = vmatpush3.bf16.msra.mxu0 (!%p192_p9), %v1631_v0  ;;  %1574 = vmatprep.subr.bf16.mxu1 (!%p192_p9), %v1633_v50  ;;  %v1637_v54 = vld [vmem:[%s2276_s3 + $0x20] sm:$0xff] (!%p192_p9)   ;;  %v1638_v55 = vld [vmem:[%s2276_s3 + $0x28] sm:$0xff] (!%p192_p9)   ;;  %v1639_v56 = vld [vmem:[%s2276_s3 + $0x30] sm:$0xff] (!%p192_p9)   ;;  %s1220_s25 = sshll.u32 (!%p192_p9), %s216_s16, 7  ;;  %s1352_s30 = sshll.u32 (!%p192_p9), %s1887_s22, 11 }
  0x10   : > { %1492 = vmatprep.subr.bf16.mxu0 (!%p192_p9), %v1632_v1  ;;  %1582 = vmatpush3.bf16.msra.mxu1 (!%p192_p9), %v1633_v50  ;;  %v1640_v57 = vld [vmem:[%s2276_s3 + $0x38] sm:$0xff] (!%p192_p9)   ;;  %v2001_v58 = vld [vmem:[%s2275_s2] ss:$0 sm:$0xff] (!%p192_p9)  ;;  %s2175_s26 = scalar_lea.vmem (!%p192_p9), [#allocation2], %s1220_s25  ;;  %s2224_s9 = scalar_lea.hbm (!%p192_p9), %s2278_s5, %s1352_s30 }
  0x11   : > { %1575 = vmatprep.subr.bf16.mxu1 (!%p192_p9), %v1634_v51  ;;  %s1154_s6 = sshll.u32 (!%p192_p9), %s2175_s26, 4  ;;  %s2232_s22 = scalar_lea.sflag (!%p192_p9), [#allocation3], %s216_s16  ;;  %s2226_s6 = int_to_ptr.vmem [resolvable:$true] %s1154_s6 }
  0x12   : > { %s1833_s11 = smov (!%p192_p9), [#allocation2]  }
  0x13   : > { %1493 = vmatpush3.bf16.msra.mxu0 (!%p192_p9), %v1632_v1  ;;  %s1773_s12 = sshll.u32 (!%p192_p9), %s1833_s11, 4  ;;  %s1774_s12 = int_to_ptr.vmem [resolvable:$false] %s1773_s12 }
  0x14   : > { %1526 = vmatprep.subr.bf16.mxu0 (!%p192_p9), %v1633_v50  ;;  %1583 = vmatpush3.bf16.msra.mxu1 (!%p192_p9), %v1634_v51  ;;  %p1776_p0 = scmp.lt.s32.totalorder (!%p192_p9), %s2226_s6, %s1774_s12 }
  0x15   : > { %s2286_s7 = smov (!%p220_p10, %s1221_s7), 63  ;;  %1576 = vmatprep.subr.bf16.mxu1 %v1635_v52 }
  0x16   : > { %s1222_s10 = sshll.u32 %s2286_s7, 3 }
  0x17   : > { %s1924_s13 = scalar_lea.vmem %s2273_s0, %s1222_s10  ;;  %s1769_s10 = scalar_lea.vmem %s2226_s6, 2048 }
  0x18   : > { %v227_v2 = vld [vmem:[%s1924_s13] sm:$0xff]  ;;  %v228_v3 = vld [vmem:[%s1924_s13 + $0x8] sm:$0xff]  ;;  %v229_v4 = vld [vmem:[%s1924_s13 + $0x10] sm:$0xff]  ;;  %1584 = vmatpush3.bf16.msra.mxu1 %v1635_v52  ;;  %p1770_p11 = scmp.ne.s32.totalorder %s2226_s6, %s1769_s10 }
  0x19   : > { %v259_v5 = vpack.c.bf16 %v228_v3, %v227_v2  ;;  %v230_v6 = vld [vmem:[%s1924_s13 + $0x18] sm:$0xff]  ;;  %v231_v7 = vld [vmem:[%s1924_s13 + $0x20] sm:$0xff]  ;;  %v232_v8 = vld [vmem:[%s1924_s13 + $0x28] sm:$0xff]  ;;  %1577 = vmatprep.subr.bf16.mxu1 %v1636_v53 }
  0x1a   : > { %v260_v9 = vpack.c.bf16 %v230_v6, %v229_v4  ;;  %v261_v10 = vpack.c.bf16 %v232_v8, %v231_v7  ;;  %v233_v11 = vld [vmem:[%s1924_s13 + $0x30] sm:$0xff]  ;;  %v234_v12 = vld [vmem:[%s1924_s13 + $0x38] sm:$0xff]  ;;  %v235_v13 = vld [vmem:[%s1924_s13 + $0x40] sm:$0xff]  ;;  %p1771_p12 = pnand %p1770_p11, %p1904_p5 }
  0x1b   : > { %1494 = vmatprep.mubr.msk.bf16.mxu0 %vm298_vm0, %v259_v5  ;;  %v236_v14 = vld [vmem:[%s1924_s13 + $0x48] sm:$0xff]  ;;  %v262_v15 = vpack.c.bf16 %v234_v12, %v233_v11  ;;  %v237_v17 = vld [vmem:[%s1924_s13 + $0x50] sm:$0xff]  ;;  %v238_v18 = vld [vmem:[%s1924_s13 + $0x58] sm:$0xff] }
  0x1c   : > { %1495 = vmatmul.mubr.msk.bf16.vlgmr.msra.gmra.mrb[0].mxu0 %vm298_vm0, %v260_v9  ;;  %v263_v16 = vpack.c.bf16 %v236_v14, %v235_v13  ;;  %v239_v19 = vld [vmem:[%s1924_s13 + $0x60] sm:$0xff]  ;;  %v240_v20 = vld [vmem:[%s1924_s13 + $0x68] sm:$0xff]  ;;  %v264_v21 = vpack.c.bf16 %v238_v18, %v237_v17  ;;  %v241_v23 = vld [vmem:[%s1924_s13 + $0x70] sm:$0xff]  ;;  %1585 = vmatpush3.bf16.msra.mxu1 %v1636_v53  ;;  %p1772_p13 = pneg %p1771_p12 }
  0x1d   : > { %1498 = vmatprep.mubr.msk.bf16.mxu0 %vm298_vm0, %v261_v10  ;;  %v265_v22 = vpack.c.bf16 %v240_v20, %v239_v19  ;;  %v242_v24 = vld [vmem:[%s1924_s13 + $0x78] sm:$0xff]  ;;  %v243_v25 = vld [vmem:[%s1924_s13 + $0x80] sm:$0xff]  ;;  %v244_v26 = vld [vmem:[%s1924_s13 + $0x88] sm:$0xff]  ;;  %1527 = vmatpush3.bf16.msra.mxu0 %v1633_v50 }
  0x1e   : > { %v266_v27 = vpack.c.bf16 %v242_v24, %v241_v23  ;;  %v267_v28 = vpack.c.bf16 %v244_v26, %v243_v25  ;;  %v245_v29 = vld [vmem:[%s1924_s13 + $0x90] sm:$0xff]  ;;  %v246_v30 = vld [vmem:[%s1924_s13 + $0x98] sm:$0xff]  ;;  %v247_v31 = vld [vmem:[%s1924_s13 + $0xa0] sm:$0xff]  ;;  %1528 = vmatprep.subr.bf16.mxu0 %v1634_v51  ;;  %1578 = vmatprep.subr.bf16.mxu1 %v1637_v54 }
  0x1f   : > { %v248_v32 = vld [vmem:[%s1924_s13 + $0xa8] sm:$0xff]  ;;  %v268_v33 = vpack.c.bf16 %v246_v30, %v245_v29  ;;  %v249_v35 = vld [vmem:[%s1924_s13 + $0xb0] sm:$0xff]  ;;  %v250_v36 = vld [vmem:[%s1924_s13 + $0xb8] sm:$0xff] }
  0x20   : > { %v269_v34 = vpack.c.bf16 %v248_v32, %v247_v31  ;;  %v251_v37 = vld [vmem:[%s1924_s13 + $0xc0] sm:$0xff]  ;;  %v252_v38 = vld [vmem:[%s1924_s13 + $0xc8] sm:$0xff]  ;;  %v270_v39 = vpack.c.bf16 %v250_v36, %v249_v35  ;;  %v253_v41 = vld [vmem:[%s1924_s13 + $0xd0] sm:$0xff]  ;;  %1586 = vmatpush3.bf16.msra.mxu1 %v1637_v54 }
  0x21   : > { %v271_v40 = vpack.c.bf16 %v252_v38, %v251_v37  ;;  %v254_v42 = vld [vmem:[%s1924_s13 + $0xd8] sm:$0xff]  ;;  %v255_v43 = vld [vmem:[%s1924_s13 + $0xe0] sm:$0xff]  ;;  %v256_v44 = vld [vmem:[%s1924_s13 + $0xe8] sm:$0xff]  ;;  %1529 = vmatpush3.bf16.msra.mxu0 %v1634_v51  ;;  %1579 = vmatprep.subr.bf16.mxu1 %v1638_v55 }
  0x22   : > { %v272_v45 = vpack.c.bf16 %v254_v42, %v253_v41  ;;  %v273_v46 = vpack.c.bf16 %v256_v44, %v255_v43  ;;  %v257_v47 = vld [vmem:[%s1924_s13 + $0xf0] sm:$0xff]  ;;  %v258_v48 = vld [vmem:[%s1924_s13 + $0xf8] sm:$0xff]  ;;  %1530 = vmatprep.subr.bf16.mxu0 %v1635_v52  ;;  %s1775_s13 = scalar_lea.vmem %s1774_s12, 4096 }
  0x23   : > { %v274_v49 = vpack.c.bf16 %v258_v48, %v257_v47  ;;  %p1777_p1 = scmp.lt.s32.totalorder %s1775_s13, %s1769_s10 }
  0x24   : > { %1499 = vmatmul.mubr.msk.bf16.gmra.mrb[4].mxu0 %vm298_vm0, %v262_v15  ;;  %1587 = vmatpush3.bf16.msra.mxu1 %v1638_v55 }
  0x25   : > { %1502 = vmatprep.mubr.msk.bf16.mxu0 %vm298_vm0, %v263_v16  ;;  %1531 = vmatpush3.bf16.msra.mxu0 %v1635_v52  ;;  %p1778_p2 = por %p1777_p1, %p1776_p0 }
  0x26   : > { %1532 = vmatprep.subr.bf16.mxu0 %v1636_v53  ;;  %1580 = vmatprep.subr.bf16.mxu1 %v1639_v56 }
  0x27   : > { %p1779_p3 = pnand %p1778_p2, %p1772_p13 }
  0x28   : > { %1588 = vmatpush3.bf16.msra.mxu1 %v1639_v56 }
  0x29   : > { %1533 = vmatpush3.bf16.msra.mxu0 %v1636_v53  ;;  %1581 = vmatprep.subr.bf16.mxu1 %v1640_v57 }
  0x2a   : > { %1534 = vmatprep.subr.bf16.mxu0 %v1637_v54 }
  0x2c   : > { %1503 = vmatmul.mubr.msk.bf16.gmra.mrb[8].mxu0 %vm298_vm0, %v264_v21  ;;  %1589 = vmatpush3.bf16.msra.mxu1 %v1640_v57 }
  0x2d   : > { %1506 = vmatprep.mubr.msk.bf16.mxu0 %vm298_vm0, %v265_v22  ;;  %1535 = vmatpush3.bf16.msra.mxu0 %v1637_v54 }
  0x2e   : > { %1536 = vmatprep.subr.bf16.mxu0 %v1638_v55 }
  0x31   : > { %1537 = vmatpush3.bf16.msra.mxu0 %v1638_v55 }
  0x32   : > { %1538 = vmatprep.subr.bf16.mxu0 %v1639_v56 }
  0x34   : > { %1507 = vmatmul.mubr.msk.bf16.gmra.mrb[12].mxu0 %vm298_vm0, %v266_v27 }
  0x35   : > { %1510 = vmatprep.mubr.msk.bf16.mxu0 %vm298_vm0, %v267_v28  ;;  %1539 = vmatpush3.bf16.msra.mxu0 %v1639_v56 }
  0x36   : > { %1540 = vmatprep.subr.bf16.mxu0 %v1640_v57 }
  0x39   : > { %1541 = vmatpush3.bf16.msra.mxu0 %v1640_v57 }
  0x3c   : > { %1511 = vmatmul.mubr.msk.bf16.gmra.mrb[16].mxu0 %vm298_vm0, %v268_v33 }
  0x3d   : > { %1514 = vmatprep.mubr.msk.bf16.mxu0 %vm298_vm0, %v269_v34 }
  0x44   : > { %1515 = vmatmul.mubr.msk.bf16.gmra.mrb[20].mxu0 %vm298_vm0, %v270_v39 }
  0x45   : > { %1518 = vmatprep.mubr.msk.bf16.mxu0 %vm298_vm0, %v271_v40 }
  0x4c   : > { %1519 = vmatmul.mubr.msk.bf16.gmra.mrb[24].mxu0 %vm298_vm0, %v272_v45 }
  0x4d   : > { %1522 = vmatprep.mubr.msk.bf16.mxu0 %vm298_vm0, %v273_v46 }
  0x54   : > { %1523 = vmatmul.mubr.msk.bf16.gmra.mrb[28].mxu0 %vm298_vm0, %v274_v49 }
  0xef   : > { %v1496_v59 = vpop.f32.mrb[0].mxu0 }
  0xf0   : > { %v2004_v60 = vadd.f32 %v1496_v59, %v2001_v58  ;;  %v381_v61 = vpop.f32.mrb[1].mxu0 }
  0xf1   : > { %v2007_v62 = vadd.f32 %v2001_v58, %v381_v61  ;;  %v1497_v63 = vpop.f32.mrb[2].mxu0 }
  0xf2   : > { %v1244_v0 = vmul.f32 -1.442695, %v2004_v60  ;;  %v2011_v1 = vadd.f32 %v1497_v63, %v2001_v58  ;;  %v384_v2 = vpop.f32.mrb[3].mxu0 }
  0xf3   : > { %v1242_v3 = vmul.f32 -1.442695, %v2007_v62  ;;  %v2015_v4 = vadd.f32 %v2001_v58, %v384_v2 }
  0xf4   : > { %1641 = vpow2.f32 %v1244_v0  ;;  %v1245_v5 = vmul.f32 -1.442695, %v2011_v1 }
  0xf5   : > { %1643 = vpow2.f32 %v1242_v3  ;;  %v1243_v6 = vmul.f32 -1.442695, %v2015_v4 }
  0xf6   : > { %1645 = vpow2.f32 %v1245_v5 }
  0xf7   : > { %1647 = vpow2.f32 %v1243_v6  ;;  %v1500_v7 = vpop.f32.mrb[4].mxu0 }
  0xf8   : > { %v2020_v8 = vadd.f32 %v1500_v7, %v2001_v58  ;;  %v397_v9 = vpop.f32.mrb[5].mxu0 }
  0xf9   : > { %v2023_v10 = vadd.f32 %v2001_v58, %v397_v9  ;;  %v1501_v11 = vpop.f32.mrb[6].mxu0 }
  0xfa   : > { %v1248_v12 = vmul.f32 -1.442695, %v2020_v8  ;;  %v2027_v13 = vadd.f32 %v1501_v11, %v2001_v58  ;;  %v400_v14 = vpop.f32.mrb[7].mxu0 }
  0xfb   : > { %v1246_v15 = vmul.f32 -1.442695, %v2023_v10  ;;  %v2031_v16 = vadd.f32 %v2001_v58, %v400_v14 }
  0xfc   : > { %1649 = vpow2.f32 %v1248_v12  ;;  %v1249_v17 = vmul.f32 -1.442695, %v2027_v13 }
  0xfd   : > { %1651 = vpow2.f32 %v1246_v15  ;;  %v1247_v18 = vmul.f32 -1.442695, %v2031_v16 }
  0xfe   : > { %v1642_v19 = vpop.eup %1641  ;;  %1653 = vpow2.f32 %v1249_v17 }
  0xff   : > { %v1644_v20 = vpop.eup %1643  ;;  %v606_v21 = vadd.f32 1.0, %v1642_v19  ;;  %1655 = vpow2.f32 %v1247_v18  ;;  %v1504_v22 = vpop.f32.mrb[8].mxu0 }
 0x100   : > { %v1646_v23 = vpop.eup %1645  ;;  %v604_v24 = vadd.f32 1.0, %v1644_v20  ;;  %v2036_v25 = vadd.f32 %v1504_v22, %v2001_v58  ;;  %v413_v26 = vpop.f32.mrb[9].mxu0 }
 0x101   : > { %v1648_v27 = vpop.eup %1647  ;;  %1657 = vrcp.f32 %v606_v21  ;;  %v607_v28 = vadd.f32 1.0, %v1646_v23  ;;  %v2039_v29 = vadd.f32 %v2001_v58, %v413_v26  ;;  %v1505_v30 = vpop.f32.mrb[10].mxu0 }
 0x102   : > { %1659 = vrcp.f32 %v604_v24  ;;  %v605_v31 = vadd.f32 1.0, %v1648_v27  ;;  %v1252_v32 = vmul.f32 -1.442695, %v2036_v25  ;;  %v2043_v33 = vadd.f32 %v1505_v30, %v2001_v58  ;;  %v416_v34 = vpop.f32.mrb[11].mxu0 }
 0x103   : > { %1661 = vrcp.f32 %v607_v28  ;;  %v1250_v35 = vmul.f32 -1.442695, %v2039_v29  ;;  %v2047_v36 = vadd.f32 %v2001_v58, %v416_v34 }
 0x104   : > { %1663 = vrcp.f32 %v605_v31  ;;  %v1253_v37 = vmul.f32 -1.442695, %v2043_v33 }
 0x105   : > { %1665 = vpow2.f32 %v1252_v32  ;;  %v1251_v38 = vmul.f32 -1.442695, %v2047_v36 }
 0x106   : > { %v1650_v39 = vpop.eup %1649  ;;  %1667 = vpow2.f32 %v1250_v35 }
 0x107   : > { %v1652_v40 = vpop.eup %1651  ;;  %v610_v41 = vadd.f32 1.0, %v1650_v39  ;;  %1669 = vpow2.f32 %v1253_v37  ;;  %v1508_v42 = vpop.f32.mrb[12].mxu0 }
 0x108   : > { %v1654_v43 = vpop.eup %1653  ;;  %v608_v44 = vadd.f32 1.0, %v1652_v40  ;;  %1671 = vpow2.f32 %v1251_v38  ;;  %v2052_v45 = vadd.f32 %v1508_v42, %v2001_v58  ;;  %v429_v46 = vpop.f32.mrb[13].mxu0 }
 0x109   : > { %v1656_v47 = vpop.eup %1655  ;;  %1673 = vrcp.f32 %v610_v41  ;;  %v611_v48 = vadd.f32 1.0, %v1654_v43  ;;  %v2055_v49 = vadd.f32 %v2001_v58, %v429_v46  ;;  %v1509_v50 = vpop.f32.mrb[14].mxu0 }
 0x10a   : > { %1675 = vrcp.f32 %v608_v44  ;;  %v609_v51 = vadd.f32 1.0, %v1656_v47  ;;  %v1256_v52 = vmul.f32 -1.442695, %v2052_v45  ;;  %v2059_v53 = vadd.f32 %v1509_v50, %v2001_v58  ;;  %v432_v54 = vpop.f32.mrb[15].mxu0 }
 0x10b   : > { %v1658_v55 = vpop.eup %1657  ;;  %1677 = vrcp.f32 %v611_v48  ;;  %v1254_v56 = vmul.f32 -1.442695, %v2055_v49  ;;  %v2063_v57 = vadd.f32 %v2001_v58, %v432_v54 }
 0x10c   : > { %v1660_v59 = vpop.eup %1659  ;;  %1679 = vrcp.f32 %v609_v51  ;;  %v1257_v61 = vmul.f32 -1.442695, %v2059_v53  ;;  %v702_v3 = vmul.f32 %v1658_v55, %v2004_v60 }
 0x10d   : > { %v1662_v63 = vpop.eup %1661  ;;  %1681 = vpow2.f32 %v1256_v52  ;;  %v1255_v0 = vmul.f32 -1.442695, %v2063_v57  ;;  %v700_v7 = vmul.f32 %v1660_v59, %v2007_v62 }
 0x10e   : > { %v1664_v2 = vpop.eup %1663  ;;  %v703_v5 = vmul.f32 %v1662_v63, %v2011_v1  ;;  %1683 = vpow2.f32 %v1254_v56 }
 0x10f   : > { %v1666_v6 = vpop.eup %1665  ;;  %v701_v9 = vmul.f32 %v1664_v2, %v2015_v4  ;;  %1685 = vpow2.f32 %v1257_v61  ;;  %v1512_v11 = vpop.f32.mrb[16].mxu0 }
 0x110   : > { %v1668_v12 = vpop.eup %1667  ;;  %v733_v14 = vpack.c.bf16 %v703_v5, %v702_v3  ;;  %v614_v15 = vadd.f32 1.0, %v1666_v6  ;;  %1687 = vpow2.f32 %v1255_v0  ;;  %v2072_v17 = vadd.f32 %v1512_v11, %v2001_v58  ;;  %v445_v18 = vpop.f32.mrb[17].mxu0 }
 0x111   : > { %v1670_v19 = vpop.eup %1669  ;;  %v612_v60 = vadd.f32 1.0, %v1668_v12  ;;  %v2075_v1 = vadd.f32 %v2001_v58, %v445_v18  ;;  %v1513_v20 = vpop.f32.mrb[18].mxu0  ;;  %v732_v21 = vpack.c.bf16 %v701_v9, %v700_v7 }
 0x112   : > { %v1672_v62 = vpop.eup %1671  ;;  %1689 = vrcp.f32 %v614_v15  ;;  %v615_v4 = vadd.f32 1.0, %v1670_v19  ;;  %v1260_v22 = vmul.f32 -1.442695, %v2072_v17  ;;  %v2079_v23 = vadd.f32 %v1513_v20, %v2001_v58  ;;  %v448_v24 = vpop.f32.mrb[19].mxu0 }
 0x113   : > { %v1674_v26 = vpop.eup %1673  ;;  %1691 = vrcp.f32 %v612_v60  ;;  %v613_v27 = vadd.f32 1.0, %v1672_v62  ;;  %v1258_v28 = vmul.f32 -1.442695, %v2075_v1  ;;  %v2083_v30 = vadd.f32 %v2001_v58, %v448_v24  ;;  %1542 = vmatprep.mubr.bf16.mxu0 %v732_v21 }
 0x114   : > { %v1676_v31 = vpop.eup %1675  ;;  %1693 = vrcp.f32 %v615_v4  ;;  %v1261_v32 = vmul.f32 -1.442695, %v2079_v23  ;;  %1543 = vmatmul.mubr.bf16.vlgmr.msra.gmra.mrb[32].mxu0 %v733_v14  ;;  %v706_v38 = vmul.f32 %v1674_v26, %v2020_v8 }
 0x115   : > { %v1678_v34 = vpop.eup %1677  ;;  %1695 = vrcp.f32 %v613_v27  ;;  %v1259_v35 = vmul.f32 -1.442695, %v2083_v30  ;;  %v704_v42 = vmul.f32 %v1676_v31, %v2023_v10 }
 0x116   : > { %v1680_v37 = vpop.eup %1679  ;;  %v707_v39 = vmul.f32 %v1678_v34, %v2027_v13  ;;  %1697 = vpow2.f32 %v1260_v22 }
 0x117   : > { %v1682_v40 = vpop.eup %1681  ;;  %1699 = vpow2.f32 %v1258_v28  ;;  %v1516_v41 = vpop.f32.mrb[20].mxu0  ;;  %v705_v43 = vmul.f32 %v1680_v37, %v2031_v16 }
 0x118   : > { %v1684_v44 = vpop.eup %1683  ;;  %v618_v46 = vadd.f32 1.0, %v1682_v40  ;;  %1701 = vpow2.f32 %v1261_v32  ;;  %v2092_v47 = vadd.f32 %v1516_v41, %v2001_v58  ;;  %v461_v48 = vpop.f32.mrb[21].mxu0  ;;  %v735_v50 = vpack.c.bf16 %v707_v39, %v706_v38 }
 0x119   : > { %v1686_v51 = vpop.eup %1685  ;;  %v616_v8 = vadd.f32 1.0, %v1684_v44  ;;  %1703 = vpow2.f32 %v1259_v35  ;;  %v2095_v13 = vadd.f32 %v2001_v58, %v461_v48  ;;  %v1517_v52 = vpop.f32.mrb[22].mxu0  ;;  %v734_v54 = vpack.c.bf16 %v705_v43, %v704_v42 }
 0x11a   : > { %v1688_v55 = vpop.eup %1687  ;;  %1705 = vrcp.f32 %v618_v46  ;;  %v619_v10 = vadd.f32 1.0, %v1686_v51  ;;  %v1264_v16 = vmul.f32 -1.442695, %v2092_v47  ;;  %v2099_v56 = vadd.f32 %v1517_v52, %v2001_v58  ;;  %v464_v59 = vpop.f32.mrb[23].mxu0 }
 0x11b   : > { %1707 = vrcp.f32 %v616_v8  ;;  %v617_v61 = vadd.f32 1.0, %v1688_v55  ;;  %v1262_v63 = vmul.f32 -1.442695, %v2095_v13  ;;  %v2103_v0 = vadd.f32 %v2001_v58, %v464_v59  ;;  %1546 = vmatprep.mubr.bf16.mxu1 %v734_v54 }
 0x11c   : > { %v1690_v2 = vpop.eup %1689  ;;  %1709 = vrcp.f32 %v619_v10  ;;  %v1265_v3 = vmul.f32 -1.442695, %v2099_v56  ;;  %1547 = vmatmul.mubr.bf16.vlgmr.msra.gmra.mrb[0].mxu1 %v735_v50 }
 0x11d   : > { %v1692_v5 = vpop.eup %1691  ;;  %1711 = vrcp.f32 %v617_v61  ;;  %v1263_v6 = vmul.f32 -1.442695, %v2103_v0  ;;  %v710_v11 = vmul.f32 %v1690_v2, %v2036_v25 }
 0x11e   : > { %v1694_v7 = vpop.eup %1693  ;;  %1713 = vpow2.f32 %v1264_v16  ;;  %v708_v18 = vmul.f32 %v1692_v5, %v2039_v29 }
 0x11f   : > { %v1696_v9 = vpop.eup %1695  ;;  %v711_v12 = vmul.f32 %v1694_v7, %v2043_v33  ;;  %1715 = vpow2.f32 %v1262_v63  ;;  %v1520_v14 = vpop.f32.mrb[24].mxu0 }
 0x120   : > { %v1698_v15 = vpop.eup %1697  ;;  %v709_v19 = vmul.f32 %v1696_v9, %v2047_v36  ;;  %1717 = vpow2.f32 %v1265_v3  ;;  %v2112_v60 = vadd.f32 %v1520_v14, %v2001_v58  ;;  %v477_v20 = vpop.f32.mrb[25].mxu0 }
 0x121   : > { %v1700_v21 = vpop.eup %1699  ;;  %v622_v62 = vadd.f32 1.0, %v1698_v15  ;;  %1719 = vpow2.f32 %v1263_v6  ;;  %v2115_v4 = vadd.f32 %v2001_v58, %v477_v20  ;;  %v1521_v25 = vpop.f32.mrb[26].mxu0  ;;  %v737_v33 = vpack.c.bf16 %v711_v12, %v710_v11 }
 0x122   : > { %v1702_v22 = vpop.eup %1701  ;;  %v620_v24 = vadd.f32 1.0, %v1700_v21  ;;  %v2118_v26 = vadd.f32 %v1521_v25, %v2001_v58  ;;  %v480_v29 = vpop.f32.mrb[27].mxu0  ;;  %v736_v36 = vpack.c.bf16 %v709_v19, %v708_v18  ;;  %v1268_v31 = vmul.f32 -1.442695, %v2112_v60 }
 0x123   : > { %v1704_v27 = vpop.eup %1703  ;;  %1721 = vrcp.f32 %v622_v62  ;;  %v623_v28 = vadd.f32 1.0, %v1702_v22  ;;  %v2122_v32 = vadd.f32 %v2001_v58, %v480_v29  ;;  %v1266_v37 = vmul.f32 -1.442695, %v2115_v4 }
 0x124   : > { %v1706_v34 = vpop.eup %1705  ;;  %1723 = vrcp.f32 %v620_v24  ;;  %v621_v35 = vadd.f32 1.0, %v1704_v27  ;;  %1550 = vmatprep.mubr.bf16.mxu1 %v736_v36  ;;  %v1269_v39 = vmul.f32 -1.442695, %v2118_v26 }
 0x125   : > { %v1708_v38 = vpop.eup %1707  ;;  %1725 = vrcp.f32 %v623_v28  ;;  %1551 = vmatmul.mubr.bf16.gmra.mrb[4].mxu1 %v737_v33  ;;  %v1267_v41 = vmul.f32 -1.442695, %v2122_v32  ;;  %v714_v43 = vmul.f32 %v1706_v34, %v2052_v45 }
 0x126   : > { %v1710_v40 = vpop.eup %1709  ;;  %1727 = vrcp.f32 %v621_v35 }
 0x127   : > { %v1712_v42 = vpop.eup %1711  ;;  %v715_v44 = vmul.f32 %v1710_v40, %v2059_v53  ;;  %1729 = vpow2.f32 %v1268_v31  ;;  %v1524_v46 = vpop.f32.mrb[28].mxu0  ;;  %v712_v53 = vmul.f32 %v1708_v38, %v2055_v49 }
 0x128   : > { %v1714_v48 = vpop.eup %1713  ;;  %v713_v50 = vmul.f32 %v1712_v42, %v2063_v57  ;;  %1731 = vpow2.f32 %v1266_v37  ;;  %v2131_v51 = vadd.f32 %v1524_v46, %v2001_v58  ;;  %v493_v8 = vpop.f32.mrb[29].mxu0 }
 0x129   : > { %v1716_v52 = vpop.eup %1715  ;;  %v626_v54 = vadd.f32 1.0, %v1714_v48  ;;  %1733 = vpow2.f32 %v1269_v39  ;;  %v2134_v55 = vadd.f32 %v2001_v58, %v493_v8  ;;  %v1525_v10 = vpop.f32.mrb[30].mxu0  ;;  %v739_v45 = vpack.c.bf16 %v715_v44, %v714_v43 }
 0x12a   : > { %v1718_v16 = vpop.eup %1717  ;;  %v624_v59 = vadd.f32 1.0, %v1716_v52  ;;  %1735 = vpow2.f32 %v1267_v41  ;;  %v2138_v57 = vadd.f32 %v1525_v10, %v2001_v58  ;;  %v496_v61 = vpop.f32.mrb[31].mxu0  ;;  %v1272_v3 = vmul.f32 -1.442695, %v2131_v51 }
 0x12b   : > { %v1720_v63 = vpop.eup %1719  ;;  %1737 = vrcp.f32 %v626_v54  ;;  %v627_v2 = vadd.f32 1.0, %v1718_v16  ;;  %v2142_v5 = vadd.f32 %v2001_v58, %v496_v61  ;;  %v1270_v7 = vmul.f32 -1.442695, %v2134_v55 }
 0x12c   : > { %1739 = vrcp.f32 %v624_v59  ;;  %v625_v6 = vadd.f32 1.0, %v1720_v63  ;;  %v738_v9 = vpack.c.bf16 %v713_v50, %v712_v53  ;;  %v1273_v11 = vmul.f32 -1.442695, %v2138_v57 }
 0x12d   : > { %v1722_v49 = vpop.eup %1721  ;;  %1741 = vrcp.f32 %v627_v2  ;;  %v1271_v14 = vmul.f32 -1.442695, %v2142_v5 }
 0x12e   : > { %v1724_v12 = vpop.eup %1723  ;;  %1743 = vrcp.f32 %v625_v6  ;;  %1554 = vmatprep.mubr.bf16.mxu1 %v738_v9  ;;  %v718_v58 = vmul.f32 %v1722_v49, %v2072_v17  ;;  %v2167_v9 = vld [vmem:[%s2277_s4] ss:$0 sm:$0xff] }
 0x12f   : > { %v1726_v15 = vpop.eup %1725  ;;  %1745 = vpow2.f32 %v1272_v3  ;;  %1555 = vmatmul.mubr.bf16.gmra.mrb[8].mxu1 %v739_v45  ;;  %v716_v21 = vmul.f32 %v1724_v12, %v2075_v1 }
 0x130   : > { %v1728_v18 = vpop.eup %1727  ;;  %v719_v19 = vmul.f32 %v1726_v15, %v2079_v23  ;;  %1747 = vpow2.f32 %v1270_v7 }
 0x131   : > { %v1730_v20 = vpop.eup %1729  ;;  %v717_v62 = vmul.f32 %v1728_v18, %v2083_v30  ;;  %1749 = vpow2.f32 %v1273_v11 }
 0x132   : > { %v1732_v25 = vpop.eup %1731  ;;  %v630_v33 = vadd.f32 1.0, %v1730_v20  ;;  %1751 = vpow2.f32 %v1271_v14  ;;  %v741_v22 = vpack.c.bf16 %v719_v19, %v718_v58 }
 0x133   : > { %v1734_v24 = vpop.eup %1733  ;;  %v628_v29 = vadd.f32 1.0, %v1732_v25  ;;  %v740_v36 = vpack.c.bf16 %v717_v62, %v716_v21 }
 0x134   : > { %v1736_v27 = vpop.eup %1735  ;;  %1753 = vrcp.f32 %v630_v33  ;;  %v631_v28 = vadd.f32 1.0, %v1734_v24 }
 0x135   : > { %v1738_v17 = vpop.eup %1737  ;;  %1755 = vrcp.f32 %v628_v29  ;;  %v629_v23 = vadd.f32 1.0, %v1736_v27  ;;  %1558 = vmatprep.mubr.bf16.mxu1 %v740_v36 }
 0x136   : > { %v1740_v31 = vpop.eup %1739  ;;  %1757 = vrcp.f32 %v631_v28  ;;  %v722_v34 = vmul.f32 %v1738_v17, %v2092_v47 }
 0x137   : > { %v1742_v1 = vpop.eup %1741  ;;  %1759 = vrcp.f32 %v629_v23  ;;  %1559 = vmatmul.mubr.bf16.gmra.mrb[12].mxu1 %v741_v22  ;;  %v720_v38 = vmul.f32 %v1740_v31, %v2095_v13 }
 0x138   : > { %v1744_v30 = vpop.eup %1743  ;;  %v723_v35 = vmul.f32 %v1742_v1, %v2099_v56 }
 0x139   : > { %v1746_v37 = vpop.eup %1745  ;;  %v721_v39 = vmul.f32 %v1744_v30, %v2103_v0 }
 0x13a   : > { %v1748_v40 = vpop.eup %1747  ;;  %v634_v41 = vadd.f32 1.0, %v1746_v37  ;;  %v743_v42 = vpack.c.bf16 %v723_v35, %v722_v34 }
 0x13b   : > { %v1750_v43 = vpop.eup %1749  ;;  %v632_v44 = vadd.f32 1.0, %v1748_v40  ;;  %v742_v46 = vpack.c.bf16 %v721_v39, %v720_v38 }
 0x13c   : > { %v1752_v48 = vpop.eup %1751  ;;  %1761 = vrcp.f32 %v634_v41  ;;  %v635_v50 = vadd.f32 1.0, %v1750_v43 }
 0x13d   : > { %1763 = vrcp.f32 %v632_v44  ;;  %v633_v8 = vadd.f32 1.0, %v1752_v48  ;;  %1562 = vmatprep.mubr.bf16.mxu1 %v742_v46 }
 0x13e   : > { %v1754_v47 = vpop.eup %1753  ;;  %1765 = vrcp.f32 %v635_v50 }
 0x13f   : > { %v1756_v56 = vpop.eup %1755  ;;  %1767 = vrcp.f32 %v633_v8  ;;  %1563 = vmatmul.mubr.bf16.gmra.mrb[16].mxu1 %v743_v42  ;;  %v726_v0 = vmul.f32 %v1754_v47, %v2112_v60 }
 0x140   : > { %v1758_v13 = vpop.eup %1757  ;;  %v724_v10 = vmul.f32 %v1756_v56, %v2115_v4 }
 0x141   : > { %v1760_v52 = vpop.eup %1759  ;;  %v727_v54 = vmul.f32 %v1758_v13, %v2118_v26 }
 0x142   : > { %v725_v45 = vmul.f32 %v1760_v52, %v2122_v32 }
 0x143   : > { %v745_v16 = vpack.c.bf16 %v727_v54, %v726_v0 }
 0x144   : > { %v744_v53 = vpack.c.bf16 %v725_v45, %v724_v10 }
 0x146   : > { %v1762_v59 = vpop.eup %1761  ;;  %1566 = vmatprep.mubr.bf16.mxu1 %v744_v53 }
 0x147   : > { %v1764_v61 = vpop.eup %1763  ;;  %1567 = vmatmul.mubr.bf16.gmra.mrb[20].mxu1 %v745_v16  ;;  %v730_v3 = vmul.f32 %v1762_v59, %v2131_v51 }
 0x148   : > { %v1766_v63 = vpop.eup %1765  ;;  %v728_v26 = vmul.f32 %v1764_v61, %v2134_v55 }
 0x149   : > { %v1768_v2 = vpop.eup %1767  ;;  %v731_v60 = vmul.f32 %v1766_v63, %v2138_v57 }
 0x14a   : > { %v729_v4 = vmul.f32 %v1768_v2, %v2142_v5 }
 0x14b   : > { %v747_v6 = vpack.c.bf16 %v731_v60, %v730_v3 }
 0x14c   : > { %v746_v32 = vpack.c.bf16 %v729_v4, %v728_v26 }
 0x14e   : > { %1570 = vmatprep.mubr.bf16.mxu1 %v746_v32 }
 0x14f   : > { %1571 = vmatmul.mubr.bf16.gmra.mrb[24].mxu1 %v747_v6 }
 0x1e7   : > { %v1544_v7 = vpop.f32.mrb[32].mxu0 }
 0x1e8   : > { %v853_v49 = vpop.f32.mrb[33].mxu0  ;;  %v862_v57 = vadd.f32 %v1544_v7, %v2167_v9 }
 0x1e9   : > { %v1545_v51 = vpop.f32.mrb[34].mxu0  ;;  %v854_v11 = vadd.f32 %v2167_v9, %v853_v49 }
 0x1ea   : > { %v865_v55 = vadd.f32 %v1545_v51, %v2167_v9  ;;  %v856_v5 = vpop.f32.mrb[35].mxu0 }
 0x1eb   : > { %v857_v12 = vadd.f32 %v2167_v9, %v856_v5 }
 0x1ec   : > { %v1361_v14 = vpack.c.bf16 %v865_v55, %v862_v57 }
 0x1ed   : > { %v1356_v15 = vpack.c.bf16 %v857_v12, %v854_v11 }
 0x1ee   : > { %1433 = vst [vmem:[%s2175_s26 + $0x8] sm:$0xff] %v1361_v14  }
 0x1ef   : > { %1357 = vst [vmem:[%s2175_s26] sm:$0xff] %v1356_v15   ;;  %v1548_v18 = vpop.f32.mrb[0].mxu1 }
 0x1f0   : > { %v869_v58 = vpop.f32.mrb[1].mxu1  ;;  %v878_v20 = vadd.f32 %v1548_v18, %v2167_v9 }
 0x1f1   : > { %v1549_v19 = vpop.f32.mrb[2].mxu1  ;;  %v870_v25 = vadd.f32 %v2167_v9, %v869_v58 }
 0x1f2   : > { %v881_v21 = vadd.f32 %v1549_v19, %v2167_v9  ;;  %v872_v62 = vpop.f32.mrb[3].mxu1 }
 0x1f3   : > { %v873_v33 = vadd.f32 %v2167_v9, %v872_v62 }
 0x1f4   : > { %v1371_v22 = vpack.c.bf16 %v881_v21, %v878_v20 }
 0x1f5   : > { %v1366_v24 = vpack.c.bf16 %v873_v33, %v870_v25 }
 0x1f6   : > { %1435 = vst [vmem:[%s2175_s26 + $0x18] sm:$0xff] %v1371_v22  }
 0x1f7   : > { %1434 = vst [vmem:[%s2175_s26 + $0x10] sm:$0xff] %v1366_v24  }
 0x1f8   : > { %v1552_v29 = vpop.f32.mrb[4].mxu1 }
 0x1f9   : > { %v885_v36 = vpop.f32.mrb[5].mxu1  ;;  %v894_v28 = vadd.f32 %v1552_v29, %v2167_v9 }
 0x1fa   : > { %v1553_v27 = vpop.f32.mrb[6].mxu1  ;;  %v886_v31 = vadd.f32 %v2167_v9, %v885_v36 }
 0x1fb   : > { %v897_v17 = vadd.f32 %v1553_v27, %v2167_v9  ;;  %v888_v23 = vpop.f32.mrb[7].mxu1 }
 0x1fc   : > { %v889_v1 = vadd.f32 %v2167_v9, %v888_v23 }
 0x1fd   : > { %v1381_v30 = vpack.c.bf16 %v897_v17, %v894_v28 }
 0x1fe   : > { %v1376_v34 = vpack.c.bf16 %v889_v1, %v886_v31 }
 0x1ff   : > { %1437 = vst [vmem:[%s2175_s26 + $0x28] sm:$0xff] %v1381_v30  }
 0x200   : > { %1436 = vst [vmem:[%s2175_s26 + $0x20] sm:$0xff] %v1376_v34  }
 0x202   : > { %v1556_v35 = vpop.f32.mrb[8].mxu1 }
 0x203   : > { %v901_v37 = vpop.f32.mrb[9].mxu1  ;;  %v910_v39 = vadd.f32 %v1556_v35, %v2167_v9 }
 0x204   : > { %v1557_v38 = vpop.f32.mrb[10].mxu1  ;;  %v902_v42 = vadd.f32 %v2167_v9, %v901_v37 }
 0x205   : > { %v913_v40 = vadd.f32 %v1557_v38, %v2167_v9  ;;  %v904_v41 = vpop.f32.mrb[11].mxu1 }
 0x206   : > { %v905_v43 = vadd.f32 %v2167_v9, %v904_v41 }
 0x207   : > { %v1391_v44 = vpack.c.bf16 %v913_v40, %v910_v39 }
 0x208   : > { %v1386_v46 = vpack.c.bf16 %v905_v43, %v902_v42 }
 0x209   : > { %1439 = vst [vmem:[%s2175_s26 + $0x38] sm:$0xff] %v1391_v44  }
 0x20a   : > { %1438 = vst [vmem:[%s2175_s26 + $0x30] sm:$0xff] %v1386_v46   ;;  %v1560_v48 = vpop.f32.mrb[12].mxu1 }
 0x20b   : > { %v917_v50 = vpop.f32.mrb[13].mxu1  ;;  %v926_v47 = vadd.f32 %v1560_v48, %v2167_v9 }
 0x20c   : > { %v1561_v8 = vpop.f32.mrb[14].mxu1  ;;  %v918_v52 = vadd.f32 %v2167_v9, %v917_v50 }
 0x20d   : > { %v929_v56 = vadd.f32 %v1561_v8, %v2167_v9  ;;  %v920_v13 = vpop.f32.mrb[15].mxu1 }
 0x20e   : > { %v921_v0 = vadd.f32 %v2167_v9, %v920_v13 }
 0x20f   : > { %v1401_v54 = vpack.c.bf16 %v929_v56, %v926_v47 }
 0x210   : > { %v1396_v10 = vpack.c.bf16 %v921_v0, %v918_v52 }
 0x211   : > { %1441 = vst [vmem:[%s2175_s26 + $0x48] sm:$0xff] %v1401_v54  }
 0x212   : > { %1440 = vst [vmem:[%s2175_s26 + $0x40] sm:$0xff] %v1396_v10   ;;  %v1564_v45 = vpop.f32.mrb[16].mxu1 }
 0x213   : > { %v933_v16 = vpop.f32.mrb[17].mxu1  ;;  %v942_v59 = vadd.f32 %v1564_v45, %v2167_v9 }
 0x214   : > { %v1565_v53 = vpop.f32.mrb[18].mxu1  ;;  %v934_v2 = vadd.f32 %v2167_v9, %v933_v16 }
 0x215   : > { %v945_v61 = vadd.f32 %v1565_v53, %v2167_v9  ;;  %v936_v63 = vpop.f32.mrb[19].mxu1 }
 0x216   : > { %v937_v3 = vadd.f32 %v2167_v9, %v936_v63 }
 0x217   : > { %v1411_v60 = vpack.c.bf16 %v945_v61, %v942_v59 }
 0x218   : > { %v1406_v26 = vpack.c.bf16 %v937_v3, %v934_v2 }
 0x219   : > { %1443 = vst [vmem:[%s2175_s26 + $0x58] sm:$0xff] %v1411_v60  }
 0x21a   : > { %1442 = vst [vmem:[%s2175_s26 + $0x50] sm:$0xff] %v1406_v26   ;;  %v1568_v4 = vpop.f32.mrb[20].mxu1 }
 0x21b   : > { %v949_v6 = vpop.f32.mrb[21].mxu1  ;;  %v958_v7 = vadd.f32 %v1568_v4, %v2167_v9 }
 0x21c   : > { %v1569_v32 = vpop.f32.mrb[22].mxu1  ;;  %v950_v57 = vadd.f32 %v2167_v9, %v949_v6 }
 0x21d   : > { %v961_v49 = vadd.f32 %v1569_v32, %v2167_v9  ;;  %v952_v51 = vpop.f32.mrb[23].mxu1 }
 0x21e   : > { %v953_v55 = vadd.f32 %v2167_v9, %v952_v51 }
 0x21f   : > { %v1421_v5 = vpack.c.bf16 %v961_v49, %v958_v7 }
 0x220   : > { %v1416_v11 = vpack.c.bf16 %v953_v55, %v950_v57 }
 0x221   : > { %1445 = vst [vmem:[%s2175_s26 + $0x68] sm:$0xff] %v1421_v5  }
 0x222   : > { %1444 = vst [vmem:[%s2175_s26 + $0x60] sm:$0xff] %v1416_v11   ;;  %v1572_v12 = vpop.f32.mrb[24].mxu1 }
 0x223   : > { %v965_v14 = vpop.f32.mrb[25].mxu1  ;;  %v974_v18 = vadd.f32 %v1572_v12, %v2167_v9 }
 0x224   : > { %v1573_v15 = vpop.f32.mrb[26].mxu1  ;;  %v966_v20 = vadd.f32 %v2167_v9, %v965_v14 }
 0x225   : > { %v977_v58 = vadd.f32 %v1573_v15, %v2167_v9  ;;  %v968_v19 = vpop.f32.mrb[27].mxu1 }
 0x226   : > { %v969_v21 = vadd.f32 %v2167_v9, %v968_v19 }
 0x227   : > { %v1431_v62 = vpack.c.bf16 %v977_v58, %v974_v18 }
 0x228   : > { %v1426_v25 = vpack.c.bf16 %v969_v21, %v966_v20 }
 0x229   : > { %1447 = vst [vmem:[%s2175_s26 + $0x78] sm:$0xff] %v1431_v62  }
 0x22a   : > { %1446 = vst [vmem:[%s2175_s26 + $0x70] sm:$0xff] %v1426_v25  }
 0x22b   : > { %1782 = shalt.err (!%p1779_p3)
}
 0x22c   : > { %s1783_s14 = scalar_lea.hbm %s2224_s9, 2048  ;;  %s1787_s17 = scalar_lea.hbm %s2278_s5, 4096 }
 0x22d   : > { %p1784_p4 = scmp.ne.s32.totalorder %s2224_s9, %s1783_s14  ;;  %p1788_p9 = scmp.lt.u32.totalorder %s2224_s9, %s2278_s5 }
 0x22e   : > { %p1789_p10 = scmp.lt.u32.totalorder %s1787_s17, %s1783_s14  ;;  %p1791_p12 = scmp.lt.u32.totalorder %s1783_s14, %s2224_s9 }
 0x22f   : > { %p1785_p7 = pnand %p1784_p4, %p1904_p5 }
 0x230   : > { %p1790_p11 = por %p1789_p10, %p1788_p9 }
 0x231   : > { %p1786_p8 = pneg %p1785_p7 }
 0x232   : > { %p1792_p13 = por %p1791_p12, %p1790_p11 }
 0x234   : > { %p1793_p0 = pnand %p1792_p13, %p1786_p8 }
 0x236   : > { %1796 = shalt.err (!%p1793_p0)
}
 0x237   : > { %s1834_s26 = smov 64   ;;  %s1835_s30 = smov 4  }
 0x238   : > { %1590 = dma.vmem_to_hbm [thread:$0]  (%p1904_p5), %s2226_s6, 2048, %s2224_s9, %s2232_s22, %s1834_s26, %s1834_s26, %s1835_s30  }
 0x239 PF: > { %p1596_p1 = scmp.ge.s32.totalorder %s1831_s21, 2  ;;  %s1169_s7 = sand.u32 1, %s1819_s18  }
 0x23a   : > { %s1170_s8 = scalar_lea.sflag [#allocation3], %s1169_s7 }
 0x23b   : > { %p1593_p2 = pnand %p1596_p1, %p1908_p6 }
 0x23d   : > { %1814 = dma.done.wait (!%p1593_p2), %s1170_s8, 2048  }
 0x23e   : > { %1816 = vsyncadd (!%p1593_p2), %s1170_s8, 4294965248  ;;  %p15_p3 = scmp.ge.s32.totalorder %s1891_s24, 4   ;;  %s2281_s18 = smov %s1823_s19 }
 0x23f   : > { %s2282_s19 = smov %s1827_s20  ;;  %s2283_s20 = smov %s1902_s27 }
 0x240   : > { %s2284_s21 = smov %s1891_s24  ;;  %17 = sbr.rel (!%p15_p3) target bundleno = 3 (0x3), region = 75 }
 0x247   :  { %1175 = vsyncpa [#allocation3], 1 }
 0x248   :  { %1177 = vsyncpa [#allocation3 + $0x1], 1 }

</bundles_post_ra>
